<compile_context>
chip_gen: v6e
topology: v6e:2x2x1
jax: 0.10.0
libtpu: 0.0.40
codegen_flags: <defaults>
</compile_context>

<pallas_src>
import jax
import jax.numpy as jnp
from jax.experimental import pallas as pl
from jax.experimental.pallas import tpu as pltpu


def _actor_kernel(x_ref, w1_ref, b1_ref, w2_ref, b2_ref, mu_ref):
    # Layer 1: (tb, D_in) @ (D_in, H) -> f32 acc, bias-add, tanh in w2's dtype.
    x = x_ref[...].astype(w1_ref.dtype)
    acc1 = jnp.dot(x, w1_ref[...], preferred_element_type=jnp.float32)
    h = jnp.tanh((acc1 + b1_ref[...].astype(jnp.float32)).astype(w2_ref.dtype))
    # Layer 2 (mu head): (tb, H) @ (H, D_out) -> f32 acc, bias-add, tanh.
    acc2 = jnp.dot(h, w2_ref[...], preferred_element_type=jnp.float32)
    mu = jnp.tanh(acc2 + b2_ref[...].astype(jnp.float32))
    mu_ref[...] = mu.astype(mu_ref.dtype)


def _round_up(x, m):
    return ((x + m - 1) // m) * m


def actor_forward(s, params, *, block_b=4096):
    """Actor forward pass (eval, deploy=False).

    s: (B, input_dim) array (any float dtype; cast in-kernel like the reference).
    params: dict with w1 (D_in,H), b1 (1,H), w2 (H,D_out), b2 (1,D_out), std (D_out,).
    Returns {'logits': (mu, std), 'act': mu}, mirroring the PyTorch module.
    """
    B, D_in = s.shape
    H = params["w1"].shape[1]
    D_out = params["w2"].shape[1]

    # Balanced batch tiling:
    #   - bound padding waste to < 8 rows per step,
    #   - force >= 2 grid steps (when B > 8) so v7x's second TC is not idle.
    n_steps = pl.cdiv(B, block_b)
    if n_steps < 2 and B > 8:
        n_steps = 2
    tb = _round_up(pl.cdiv(B, n_steps), 8)
    b_pad = n_steps * tb
    if b_pad != B:
        s = jnp.pad(s, ((0, b_pad - B), (0, 0)))
    grid = (n_steps,)

    # Advisory cost estimate so XLA doesn't treat the tiny custom call as opaque.
    bytes_acc = (
        s.size * s.dtype.itemsize
        + params["w1"].size * params["w1"].dtype.itemsize
        + params["b1"].size * params["b1"].dtype.itemsize
        + params["w2"].size * params["w2"].dtype.itemsize
        + params["b2"].size * params["b2"].dtype.itemsize
        + b_pad * D_out * 4
    )
    cost = pl.CostEstimate(
        flops=2 * b_pad * (D_in * H + H * D_out),
        transcendentals=b_pad * (H + D_out),
        bytes_accessed=bytes_acc,
    )

    mu_pad = pl.pallas_call(
        _actor_kernel,
        out_shape=jax.ShapeDtypeStruct((b_pad, D_out), jnp.float32),
        grid=grid,
        in_specs=[
            pl.BlockSpec((tb, D_in), lambda i: (i, 0)),   # x: streamed per batch tile
            pl.BlockSpec((D_in, H), lambda i: (0, 0)),    # w1: VMEM-resident across steps
            pl.BlockSpec((1, H), lambda i: (0, 0)),       # b1
            pl.BlockSpec((H, D_out), lambda i: (0, 0)),   # w2 (narrow, full last dim)
            pl.BlockSpec((1, D_out), lambda i: (0, 0)),   # b2
        ],
        out_specs=pl.BlockSpec((tb, D_out), lambda i: (i, 0)),  # narrow real output
        compiler_params=pltpu.CompilerParams(
            dimension_semantics=("parallel",),            # v7x: batch axis over both TCs
        ),
        cost_estimate=cost,
    )(s, params["w1"], params["b1"], params["w2"], params["b2"])

    mu = mu_pad[:B] if b_pad != B else mu_pad
    std = params["std"]  # parameter passthrough, no compute
    # TODO(synk): training branch samples from Normal(mu, std); sampling is
    # host-side RNG in the reference and is intentionally not done in-kernel.
    return {"logits": (mu, std), "act": mu}


def init_params(key, input_dim, hidden, output_dim, dtype=jnp.float32):
    # bf16 weights work on all generations (MXU is natively bf16 on v5e too);
    # bias-add/tanh accumulation stays f32 in-kernel.  Casting here keeps the
    # per-call jitted graph free of parameter prep work.
    k1, k2, k3, k4 = jax.random.split(key, 4)
    scale1 = 1.0 / jnp.sqrt(input_dim)
    scale2 = 1.0 / jnp.sqrt(hidden)
    return {
        "w1": (jax.random.uniform(k1, (input_dim, hidden), jnp.float32, -1, 1) * scale1).astype(dtype),
        "b1": (jax.random.uniform(k2, (1, hidden), jnp.float32, -1, 1) * scale1).astype(jnp.float32),
        "w2": (jax.random.uniform(k3, (hidden, output_dim), jnp.float32, -1, 1) * scale2).astype(dtype),
        "b2": (jax.random.uniform(k4, (1, output_dim), jnp.float32, -1, 1) * scale2).astype(jnp.float32),
        "std": jnp.ones((output_dim,), jnp.float32) * 0.8,
    }


if __name__ == "__main__":
    INPUT_DIM = 16
    HIDDEN = 128
    OUTPUT_DIM = 4
    BATCH = 8

    key = jax.random.PRNGKey(0)
    pkey, xkey = jax.random.split(key)
    params = init_params(pkey, INPUT_DIM, HIDDEN, OUTPUT_DIM)  # f32 -> exact vs reference
    s = jax.random.normal(xkey, (BATCH, INPUT_DIM), dtype=jnp.float32)

    out = actor_forward(s, params)
    jax.block_until_ready(out["act"])

    # Reference check in plain JAX (f32 params -> tight tolerance; loosen for bf16).
    h_ref = jnp.tanh(s @ params["w1"] + params["b1"])
    mu_ref = jnp.tanh(h_ref @ params["w2"] + params["b2"])
    assert out["act"].shape == (BATCH, OUTPUT_DIM)
    assert jnp.allclose(out["act"], mu_ref, atol=1e-5), "mismatch vs reference"
    assert jnp.allclose(out["logits"][1], 0.8), "std parameter mismatch"

    print("KERNEL_OK")
</pallas_src>

<mosaic_0001>
module attributes {stable_mosaic.version = 11 : i64} {
  func.func @_actor_kernel(%arg0: i32, %arg1: memref<8x16xf32, #tpu.memory_space<vmem>>, %arg2: memref<16x128xf32, #tpu.memory_space<vmem>>, %arg3: memref<1x128xf32, #tpu.memory_space<vmem>>, %arg4: memref<128x4xf32, #tpu.memory_space<vmem>>, %arg5: memref<1x4xf32, #tpu.memory_space<vmem>>, %arg6: memref<8x4xf32, #tpu.memory_space<vmem>>) attributes {dimension_semantics = [#tpu.dimension_semantics<parallel>], iteration_bounds = array<i64: 1>, scalar_prefetch = 0 : i64, scratch_operands = 0 : i64, tpu.core_type = #tpu.core_type<tc>, window_params = [{transform_indices = @transform_0, window_bounds = array<i64: 8, 16>}, {pipeline_mode = #tpu.pipeline_mode<synchronous>, transform_indices = @transform_1, window_bounds = array<i64: 16, 128>}, {pipeline_mode = #tpu.pipeline_mode<synchronous>, transform_indices = @transform_2, window_bounds = array<i64: 1, 128>}, {pipeline_mode = #tpu.pipeline_mode<synchronous>, transform_indices = @transform_3, window_bounds = array<i64: 128, 4>}, {pipeline_mode = #tpu.pipeline_mode<synchronous>, transform_indices = @transform_4, window_bounds = array<i64: 1, 4>}, {transform_indices = @transform_5, window_bounds = array<i64: 8, 4>}]} {
    %c0 = arith.constant 0 : index
    %c0_0 = arith.constant 0 : index
    %0 = vector.load %arg1[%c0, %c0_0] : memref<8x16xf32, #tpu.memory_space<vmem>>, vector<8x16xf32>
    %c0_1 = arith.constant 0 : index
    %c0_2 = arith.constant 0 : index
    %1 = vector.load %arg2[%c0_1, %c0_2] : memref<16x128xf32, #tpu.memory_space<vmem>>, vector<16x128xf32>
    %cst = arith.constant dense<0.000000e+00> : vector<8x128xf32>
    %2 = tpu.matmul %0, %1, %cst {dimension_numbers = #tpu.dot_dimension_numbers<[1], [0], [0], [1], [0, 0, 1, 1], [], []>} : vector<8x16xf32>, vector<16x128xf32>, vector<8x128xf32> -> vector<8x128xf32>
    %c0_3 = arith.constant 0 : index
    %c0_4 = arith.constant 0 : index
    %3 = vector.load %arg3[%c0_3, %c0_4] : memref<1x128xf32, #tpu.memory_space<vmem>>, vector<1x128xf32>
    %4 = vector.broadcast %3 : vector<1x128xf32> to vector<8x128xf32>
    %5 = arith.addf %2, %4 : vector<8x128xf32>
    %6 = math.tanh %5 : vector<8x128xf32>
    %c0_5 = arith.constant 0 : index
    %c0_6 = arith.constant 0 : index
    %7 = vector.load %arg4[%c0_5, %c0_6] : memref<128x4xf32, #tpu.memory_space<vmem>>, vector<128x4xf32>
    %cst_7 = arith.constant dense<0.000000e+00> : vector<8x4xf32>
    %8 = tpu.matmul %6, %7, %cst_7 {dimension_numbers = #tpu.dot_dimension_numbers<[1], [0], [0], [1], [0, 0, 1, 1], [], []>} : vector<8x128xf32>, vector<128x4xf32>, vector<8x4xf32> -> vector<8x4xf32>
    %c0_8 = arith.constant 0 : index
    %c0_9 = arith.constant 0 : index
    %9 = vector.load %arg5[%c0_8, %c0_9] : memref<1x4xf32, #tpu.memory_space<vmem>>, vector<1x4xf32>
    %10 = vector.broadcast %9 : vector<1x4xf32> to vector<8x4xf32>
    %11 = arith.addf %8, %10 : vector<8x4xf32>
    %12 = math.tanh %11 : vector<8x4xf32>
    %c0_10 = arith.constant 0 : index
    %c0_11 = arith.constant 0 : index
    %13 = vector.load %arg6[%c0_10, %c0_11] : memref<8x4xf32, #tpu.memory_space<vmem>>, vector<8x4xf32>
    tpu.vector_store %arg6[%c0_10, %c0_11], %12 {strides = array<i32>} : memref<8x4xf32, #tpu.memory_space<vmem>>, vector<8x4xf32>,
    return
  }
  func.func @transform_0(%arg0: i32) -> (i32, i32) {
    %c0_i32 = arith.constant 0 : i32
    %c0_i32_0 = arith.constant 0 : i32
    return %arg0, %c0_i32 : i32, i32
  }
  func.func @transform_1(%arg0: i32) -> (i32, i32) {
    %c0_i32 = arith.constant 0 : i32
    %c0_i32_0 = arith.constant 0 : i32
    %c0_i32_1 = arith.constant 0 : i32
    return %c0_i32, %c0_i32_0 : i32, i32
  }
  func.func @transform_2(%arg0: i32) -> (i32, i32) {
    %c0_i32 = arith.constant 0 : i32
    %c0_i32_0 = arith.constant 0 : i32
    %c0_i32_1 = arith.constant 0 : i32
    return %c0_i32, %c0_i32_0 : i32, i32
  }
  func.func @transform_3(%arg0: i32) -> (i32, i32) {
    %c0_i32 = arith.constant 0 : i32
    %c0_i32_0 = arith.constant 0 : i32
    %c0_i32_1 = arith.constant 0 : i32
    return %c0_i32, %c0_i32_0 : i32, i32
  }
  func.func @transform_4(%arg0: i32) -> (i32, i32) {
    %c0_i32 = arith.constant 0 : i32
    %c0_i32_0 = arith.constant 0 : i32
    %c0_i32_1 = arith.constant 0 : i32
    return %c0_i32, %c0_i32_0 : i32, i32
  }
  func.func @transform_5(%arg0: i32) -> (i32, i32) {
    %c0_i32 = arith.constant 0 : i32
    %c0_i32_0 = arith.constant 0 : i32
    return %arg0, %c0_i32 : i32, i32
  }
}

</mosaic_0001>

<bundles_post_ra>
// kernel: tpu_custom_call.1
= control target key start
LH: loop header
LB: loop body
LE: loop exit
PB: predicated region body
PF: predicated region fallthrough
CT: control target
= control target key end

     0   :  { %v276_v0 = vmov 0.0   ;;  %vm277_vm0 = vmmov 0   ;;  %vm30_vm1 = vcmask 130048   ;;  %vm199_vm2 = vcmask 31744   ;;  %s376_s1 = inlined_call_operand.vmem [shape: f32[16,128], index: 1, kind: input, shape index: {}]   ;;  %s377_s0 = inlined_call_operand.vmem [shape: f32[8,16], index: 0, kind: input, shape index: {}]   ;;  %s378_s3 = inlined_call_operand.vmem [shape: f32[128,4], index: 3, kind: input, shape index: {}]   ;;  %s379_s2 = inlined_call_operand.vmem [shape: f32[1,128], index: 2, kind: input, shape index: {}]   ;;  %s380_s4 = inlined_call_operand.vmem [shape: f32[1,4], index: 4, kind: input, shape index: {}]   ;;  %s381_s5 = inlined_call_operand.vmem [shape: f32[8,4], index: 5, kind: output, shape index: {}]  }
   0x1   :  { %228 = vmatprep.subr.mxu0 %v276_v0  ;;  %v22_v1 = vld [vmem:[%s376_s1 + $0x8] sm:$0xff]  ;;  %v21_v2 = vld [vmem:[%s376_s1] sm:$0xff]  ;;  %232 = vmatprep.mubr.msk.f32.mxu0 %vm277_vm0, %v276_v0  ;;  %v120_v4 = vld [vmem:[%s378_s3 + $0x78] sm:$0xff] }
   0x2   :  { %229 = vmatpush3.msra.mxu0 %v22_v1  ;;  %v20_v3 = vld [vmem:[%s377_s0] sm:$0xff]  ;;  %235 = vmatprep.subr.mxu1 %v276_v0  ;;  %v119_v5 = vld [vmem:[%s378_s3 + $0x70] sm:$0xff]  ;;  %v118_v6 = vld [vmem:[%s378_s3 + $0x68] sm:$0xff] }
   0x3   :  { %230 = vmatprep.subr.mxu0 %v276_v0  ;;  %236 = vmatpush3.msra.mxu1 %v120_v4  ;;  %v117_v7 = vld [vmem:[%s378_s3 + $0x60] sm:$0xff]  ;;  %v116_v8 = vld [vmem:[%s378_s3 + $0x58] sm:$0xff]  ;;  %v115_v9 = vld [vmem:[%s378_s3 + $0x50] sm:$0xff] }
   0x4   :  { %231 = vmatpush3.msra.mxu0 %v21_v2  ;;  %237 = vmatprep.subr.mxu1 %v276_v0  ;;  %v114_v10 = vld [vmem:[%s378_s3 + $0x48] sm:$0xff]  ;;  %v113_v11 = vld [vmem:[%s378_s3 + $0x40] sm:$0xff]  ;;  %v112_v12 = vld [vmem:[%s378_s3 + $0x38] sm:$0xff] }
   0x5   :  { %233 = vmatmul.mubr.msk.f32.vlgmr.msra.gmra.mxu0 %vm30_vm1, %v20_v3  ;;  %238 = vmatpush3.msra.mxu1 %v119_v5  ;;  %v111_v13 = vld [vmem:[%s378_s3 + $0x30] sm:$0xff]  ;;  %v110_v14 = vld [vmem:[%s378_s3 + $0x28] sm:$0xff]  ;;  %v109_v15 = vld [vmem:[%s378_s3 + $0x20] sm:$0xff] }
   0x6   :  { %239 = vmatprep.subr.mxu1 %v276_v0  ;;  %267 = vmatprep.mubr.msk.f32.mxu1 %vm277_vm0, %v276_v0  ;;  %v108_v16 = vld [vmem:[%s378_s3 + $0x18] sm:$0xff]  ;;  %v107_v17 = vld [vmem:[%s378_s3 + $0x10] sm:$0xff]  ;;  %v106_v18 = vld [vmem:[%s378_s3 + $0x8] sm:$0xff] }
   0x7   :  { %240 = vmatpush3.msra.mxu1 %v118_v6  ;;  %v105_v19 = vld [vmem:[%s378_s3] sm:$0xff] }
   0x8   :  { %241 = vmatprep.subr.mxu1 %v276_v0  ;;  %v205_v20 = vld [vmem:[%s379_s2] ss:$0 sm:$0xff] }
   0x9   :  { %242 = vmatpush3.msra.mxu1 %v117_v7  ;;  %v207_v25 = vld [vmem:[%s380_s4] ss:$0 sm:$0xff] }
   0xa   :  { %243 = vmatprep.subr.mxu1 %v276_v0 }
   0xb   :  { %244 = vmatpush3.msra.mxu1 %v116_v8 }
   0xc   :  { %245 = vmatprep.subr.mxu1 %v276_v0 }
   0xd   :  { %246 = vmatpush3.msra.mxu1 %v115_v9 }
   0xe   :  { %247 = vmatprep.subr.mxu1 %v276_v0 }
   0xf   :  { %248 = vmatpush3.msra.mxu1 %v114_v10 }
  0x10   :  { %249 = vmatprep.subr.mxu1 %v276_v0 }
  0x11   :  { %250 = vmatpush3.msra.mxu1 %v113_v11 }
  0x12   :  { %251 = vmatprep.subr.mxu1 %v276_v0 }
  0x13   :  { %252 = vmatpush3.msra.mxu1 %v112_v12 }
  0x14   :  { %253 = vmatprep.subr.mxu1 %v276_v0 }
  0x15   :  { %254 = vmatpush3.msra.mxu1 %v111_v13 }
  0x16   :  { %255 = vmatprep.subr.mxu1 %v276_v0 }
  0x17   :  { %256 = vmatpush3.msra.mxu1 %v110_v14 }
  0x18   :  { %257 = vmatprep.subr.mxu1 %v276_v0 }
  0x19   :  { %258 = vmatpush3.msra.mxu1 %v109_v15 }
  0x1a   :  { %259 = vmatprep.subr.mxu1 %v276_v0 }
  0x1b   :  { %260 = vmatpush3.msra.mxu1 %v108_v16 }
  0x1c   :  { %261 = vmatprep.subr.mxu1 %v276_v0 }
  0x1d   :  { %262 = vmatpush3.msra.mxu1 %v107_v17 }
  0x1e   :  { %263 = vmatprep.subr.mxu1 %v276_v0 }
  0x1f   :  { %264 = vmatpush3.msra.mxu1 %v106_v18 }
  0x20   :  { %265 = vmatprep.subr.mxu1 %v276_v0 }
  0x21   :  { %266 = vmatpush3.msra.mxu1 %v105_v19 }
  0xc5   :  { %v100_v21 = vpop.f32.mrf.mxu0 }
  0xc6   :  { %v101_v22 = vadd.f32 %v205_v20, %v100_v21 }
  0xc7   :  { %v234_v23 = vpop.f32.mrf.mxu0 }
  0xc8   :  { %272 = vtanh.f32 %v101_v22 }
  0xd5   :  { %v273_v24 = vpop.eup %272 }
  0xd6   :  { %268 = vmatmul.mubr.f32.vlgmr.msra.gmra.mxu1 %v273_v24 }
 0x196   :  { %v194_v26 = vpop.f32.mrf.mxu1 }
 0x197   :  { %v195_v27 = vadd.f32 %v207_v25, %v194_v26 }
 0x198   :  { %v269_v28 = vpop.f32.mrf.mxu1 }
 0x199   :  { %274 = vtanh.f32 %v195_v27 }
 0x1a6   :  { %v275_v29 = vpop.eup %274 }
 0x1a7   :  { %200 = vst.msk [vmem:[%s381_s5] sm:$0xff] %vm199_vm2, %v275_v29 }

</bundles_post_ra>
